<compile_context>
chip_gen: v7x
topology: tpu7x:2x2x1
jax: 0.10.0
libtpu: 0.0.40
codegen_flags: <defaults>
</compile_context>

<pallas_src>
import jax
import jax.numpy as jnp
from jax.experimental import pallas as pl
from jax.experimental.pallas import tpu as pltpu


def _round_up(v, m):
    return (v + m - 1) // m * m


def _cdiv(a, b):
    return -(-a // b)


def _vmem_limit_bytes():
    """Kernel VMEM limit derived from the running chip, ~20% headroom."""
    cap = None
    try:
        cap = getattr(pltpu.get_tpu_info(), "vmem_capacity_bytes", None)
    except Exception:
        cap = None
    if not cap:
        cap = 64 * 1024 * 1024          # conservative (v7x-sized) fallback
    return max(16 * 1024 * 1024, int(cap * 0.8))


def diffusion_gcn(x, supports, weight, bias, *, order=1,
                  compute_dtype=jnp.bfloat16, out_dtype=jnp.float32):
    """Fused Diffusion_GCN forward (eval mode).

    x:        (B, C, N, T) float32
    supports: list of S adjacency matrices, each (N, N)
    weight:   (c_out, (order*S + 1) * C)   (1x1 Conv2d weight, squeezed)
    bias:     (c_out,)
    returns:  (B, c_out, N, T) in x.dtype
    """
    B, C, N, T = x.shape
    S = len(supports)
    c_out, c_in_total = weight.shape
    n_terms = order * S + 1
    K = n_terms * C
    assert c_in_total == K, "weight does not match (order*support_len+1)*c_in"

    cd_bytes = jnp.dtype(compute_dtype).itemsize
    out_bytes = jnp.dtype(out_dtype).itemsize

    # ---- tiling: nodes padded to full 128-lane tiles; BT tile from VMEM budget ----
    Np = _round_up(N, 128)
    BT = B * T

    vmem_limit = _vmem_limit_bytes()
    # Per-step VMEM bytes per folded-bt row (x/out tiles are double-buffered by the
    # BlockSpec pipeline; scratch / f32 hop result / f32 conv accumulator are single).
    per_row = Np * (2 * C * cd_bytes          # x tile (double-buffered)
                    + 2 * c_out * out_bytes   # out tile (double-buffered)
                    + K * cd_bytes            # concatenated-term scratch
                    + C * (4 + cd_bytes)      # f32 hop result + its cd cast
                    + c_out * 4)              # f32 conv accumulator
    fixed = (2 * S * Np * Np * cd_bytes       # grid-invariant supports (double-buffered)
             + 2 * c_out * K * cd_bytes + (64 << 10))
    budget = int(vmem_limit * 0.85)           # slack for compiler-internal scratch
    rows = (budget - fixed) // per_row
    rows = max(8, min(512, (rows // 8) * 8))  # 512-row cap amortizes ~0.35us/step
    n_steps = _cdiv(BT, rows)
    if n_steps == 1 and BT >= 16:
        n_steps = 2                           # give v7x's second TensorCore work
    if n_steps > 1 and n_steps % 2:
        n_steps += 1                          # even split across two TensorCores
    bt_tile = _round_up(_cdiv(BT, n_steps), 8)
    BT_p = n_steps * bt_tile

    # -------- host-side layout plumbing (outside the kernel, fused by XLA) --------
    # TODO(synk): allow_input_fusion could fold this transpose/pad/cast into the
    # pallas_call operand and save one HBM round trip of the activations.
    xw = jnp.transpose(x, (1, 0, 3, 2)).reshape(C, BT, N)
    xw = jnp.pad(xw, ((0, 0), (0, BT_p - BT), (0, Np - N))).astype(compute_dtype)
    a_all = jnp.stack([jnp.pad(a, ((0, Np - N), (0, Np - N))) for a in supports])
    a_all = a_all.astype(compute_dtype)
    # PyTorch's channel-concat order [x, s0 hop1..hopO, s1 hop1..hopO, ...] is exactly
    # the scratch row order below, so the conv weight is used as-is: (c_out, K).
    w2d = weight.astype(compute_dtype)
    b3 = bias.reshape(c_out, 1, 1).astype(jnp.float32)

    def kernel(x_ref, a_ref, w_ref, b_ref, o_ref, h_ref):
        # x_ref: (C, bt, Np)   a_ref: (S, Np, Np)   w_ref: (c_out, K)
        # b_ref: (c_out,1,1)   o_ref: (c_out, bt, Np)   h_ref: (K, bt, Np) scratch
        x3 = x_ref[...]
        h_ref[0:C] = x3                                    # identity term
        col = 1
        for s in range(S):
            cur = x3.reshape(C * bt_tile, Np)              # layout-preserving collapse
            for _ in range(order):
                # Diffusion hop: one lane-dense MXU matmul contracting over nodes.
                nxt = jnp.dot(cur, a_ref[s], preferred_element_type=jnp.float32)
                nxt_cd = nxt.astype(compute_dtype)
                h_ref[col * C:(col + 1) * C] = nxt_cd.reshape(C, bt_tile, Np)
                cur = nxt_cd
                col += 1
        # Fused 1x1 conv: ONE contraction over the concatenated n_terms*C axis
        # instead of n_terms+1 low-occupancy (c_out x C) passes.
        y = jnp.einsum('ok,kbn->obn', w_ref[...], h_ref[...],
                       preferred_element_type=jnp.float32)
        y = y + b_ref[...]                                 # (c_out,1,1) broadcast
        # TODO(synk): training-mode dropout would need pltpu.prng_* here.
        o_ref[...] = y.astype(o_ref.dtype)

    out = pl.pallas_call(
        kernel,
        out_shape=jax.ShapeDtypeStruct((c_out, BT_p, Np), out_dtype),
        grid_spec=pltpu.PrefetchScalarGridSpec(
            num_scalar_prefetch=0,
            grid=(n_steps,),
            in_specs=[
                pl.BlockSpec((C, bt_tile, Np), lambda i: (0, i, 0)),
                # Grid-invariant operands: fixed block index -> the pipeline reuses
                # the fetched copy; their buffers are counted in the VMEM budget.
                pl.BlockSpec((S, Np, Np), lambda i: (0, 0, 0)),
                pl.BlockSpec((c_out, K), lambda i: (0, 0)),
                pl.BlockSpec((c_out, 1, 1), lambda i: (0, 0, 0)),
            ],
            out_specs=pl.BlockSpec((c_out, bt_tile, Np), lambda i: (0, i, 0)),
            scratch_shapes=[pltpu.VMEM((K, bt_tile, Np), compute_dtype)],
        ),
        compiler_params=pltpu.CompilerParams(
            dimension_semantics=("parallel",),
            vmem_limit_bytes=vmem_limit,
        ),
    )(xw, a_all, w2d, b3)

    # Un-pad and restore the PyTorch (B, c_out, N, T) layout.
    out = out[:, :BT, :N].reshape(c_out, B, T, N)
    return jnp.transpose(out, (1, 0, 3, 2)).astype(x.dtype)


def diffusion_gcn_ref(x, supports, weight, bias, order=1):
    """Pure-JAX reference matching the PyTorch forward (dropout in eval mode)."""
    out = [x]
    for a in supports:
        x1 = jnp.einsum('bcnt,nm->bcmt', x, a)
        out.append(x1)
        for _ in range(2, order + 1):
            x1 = jnp.einsum('bcnt,nm->bcmt', x1, a)
            out.append(x1)
    h = jnp.concatenate(out, axis=1)
    return jnp.einsum('oc,bcnt->bont', weight, h) + bias[None, :, None, None]


if __name__ == "__main__":
    key = jax.random.PRNGKey(0)
    B, c_in, N, T = 2, 4, 16, 8
    c_out, support_len = 8, 2

    k1, k2, k3, k4, k5, k6 = jax.random.split(key, 6)
    x = jax.random.normal(k1, (B, c_in, N, T), dtype=jnp.float32)
    a0 = jax.random.uniform(k2, (N, N), dtype=jnp.float32)
    a0 = a0 / jnp.sum(a0, axis=1, keepdims=True)      # row-normalized adjacency
    a1 = jax.random.uniform(k3, (N, N), dtype=jnp.float32)
    a1 = a1 / jnp.sum(a1, axis=1, keepdims=True)
    supports = [a0, a1]
    bias = jax.random.normal(k5, (c_out,), dtype=jnp.float32) * 0.1

    # order = 1 ------------------------------------------------------------------
    w1 = jax.random.normal(k4, (c_out, (1 * support_len + 1) * c_in),
                           dtype=jnp.float32) * 0.1
    y_ref1 = diffusion_gcn_ref(x, supports, w1, bias, order=1)

    y32 = jax.block_until_ready(
        diffusion_gcn(x, supports, w1, bias, order=1, compute_dtype=jnp.float32))
    assert y32.shape == (B, c_out, N, T)
    assert jnp.allclose(y32, y_ref1, atol=1e-4, rtol=1e-4)

    ybf = jax.block_until_ready(diffusion_gcn(x, supports, w1, bias, order=1))
    assert ybf.shape == (B, c_out, N, T)
    assert jnp.allclose(ybf, y_ref1, atol=3e-2, rtol=3e-2)

    # order = 2 (exercises the multi-hop chain), exact f32 path --------------------
    w2 = jax.random.normal(k6, (c_out, (2 * support_len + 1) * c_in),
                           dtype=jnp.float32) * 0.1
    y_ref2 = diffusion_gcn_ref(x, supports, w2, bias, order=2)
    y2 = jax.block_until_ready(
        diffusion_gcn(x, supports, w2, bias, order=2, compute_dtype=jnp.float32))
    assert y2.shape == (B, c_out, N, T)
    assert jnp.allclose(y2, y_ref2, atol=1e-4, rtol=1e-4)

    print("KERNEL_OK")
</pallas_src>

<mosaic_0001>
module attributes {stable_mosaic.version = 11 : i64} {
  func.func @kernel(%arg0: i32, %arg1: memref<4x8x128xf32, #tpu.memory_space<vmem>>, %arg2: memref<2x128x128xf32, #tpu.memory_space<vmem>>, %arg3: memref<8x12xf32, #tpu.memory_space<vmem>>, %arg4: memref<8x1x1xf32, #tpu.memory_space<vmem>>, %arg5: memref<8x8x128xf32, #tpu.memory_space<vmem>>, %arg6: memref<12x8x128xf32, #tpu.memory_space<vmem>>) attributes {dimension_semantics = [#tpu.dimension_semantics<parallel>], iteration_bounds = array<i64: 2>, scalar_prefetch = 0 : i64, scratch_operands = 1 : i64, tpu.core_type = #tpu.core_type<tc>, window_params = [{transform_indices = @transform_0, window_bounds = array<i64: 4, 8, 128>}, {pipeline_mode = #tpu.pipeline_mode<synchronous>, transform_indices = @transform_1, window_bounds = array<i64: 2, 128, 128>}, {pipeline_mode = #tpu.pipeline_mode<synchronous>, transform_indices = @transform_2, window_bounds = array<i64: 8, 12>}, {pipeline_mode = #tpu.pipeline_mode<synchronous>, transform_indices = @transform_3, window_bounds = array<i64: 8, 1, 1>}, {transform_indices = @transform_4, window_bounds = array<i64: 8, 8, 128>}]} {
    %c0 = arith.constant 0 : index
    %c0_0 = arith.constant 0 : index
    %c0_1 = arith.constant 0 : index
    %0 = vector.load %arg1[%c0, %c0_0, %c0_1] : memref<4x8x128xf32, #tpu.memory_space<vmem>>, vector<4x8x128xf32>
    %c0_2 = arith.constant 0 : index
    %c0_3 = arith.constant 0 : index
    %c0_4 = arith.constant 0 : index
    %1 = vector.load %arg6[%c0_2, %c0_3, %c0_4] : memref<12x8x128xf32, #tpu.memory_space<vmem>>, vector<4x8x128xf32>
    tpu.vector_store %arg6[%c0_2, %c0_3, %c0_4], %0 {strides = array<i32>} : memref<12x8x128xf32, #tpu.memory_space<vmem>>, vector<4x8x128xf32>,
    %2 = vector.shape_cast %0 : vector<4x8x128xf32> to vector<32x128xf32>
    %c0_5 = arith.constant 0 : index
    %c0_6 = arith.constant 0 : index
    %c0_7 = arith.constant 0 : index
    %3 = vector.load %arg2[%c0_5, %c0_6, %c0_7] : memref<2x128x128xf32, #tpu.memory_space<vmem>>, vector<1x128x128xf32>
    %4 = vector.shape_cast %3 : vector<1x128x128xf32> to vector<128x128xf32>
    %cst = arith.constant dense<0.000000e+00> : vector<32x128xf32>
    %5 = tpu.matmul %2, %4, %cst {dimension_numbers = #tpu.dot_dimension_numbers<[1], [0], [0], [1], [0, 0, 1, 1], [], []>} : vector<32x128xf32>, vector<128x128xf32>, vector<32x128xf32> -> vector<32x128xf32>
    %6 = vector.shape_cast %5 : vector<32x128xf32> to vector<4x8x128xf32>
    %c4 = arith.constant 4 : index
    %c0_8 = arith.constant 0 : index
    %c0_9 = arith.constant 0 : index
    %7 = vector.load %arg6[%c4, %c0_8, %c0_9] : memref<12x8x128xf32, #tpu.memory_space<vmem>>, vector<4x8x128xf32>
    tpu.vector_store %arg6[%c4, %c0_8, %c0_9], %6 {strides = array<i32>} : memref<12x8x128xf32, #tpu.memory_space<vmem>>, vector<4x8x128xf32>,
    %8 = vector.shape_cast %0 : vector<4x8x128xf32> to vector<32x128xf32>
    %c1 = arith.constant 1 : index
    %c0_10 = arith.constant 0 : index
    %c0_11 = arith.constant 0 : index
    %9 = vector.load %arg2[%c1, %c0_10, %c0_11] : memref<2x128x128xf32, #tpu.memory_space<vmem>>, vector<1x128x128xf32>
    %10 = vector.shape_cast %9 : vector<1x128x128xf32> to vector<128x128xf32>
    %cst_12 = arith.constant dense<0.000000e+00> : vector<32x128xf32>
    %11 = tpu.matmul %8, %10, %cst_12 {dimension_numbers = #tpu.dot_dimension_numbers<[1], [0], [0], [1], [0, 0, 1, 1], [], []>} : vector<32x128xf32>, vector<128x128xf32>, vector<32x128xf32> -> vector<32x128xf32>
    %12 = vector.shape_cast %11 : vector<32x128xf32> to vector<4x8x128xf32>
    %c8 = arith.constant 8 : index
    %c0_13 = arith.constant 0 : index
    %c0_14 = arith.constant 0 : index
    %13 = vector.load %arg6[%c8, %c0_13, %c0_14] : memref<12x8x128xf32, #tpu.memory_space<vmem>>, vector<4x8x128xf32>
    tpu.vector_store %arg6[%c8, %c0_13, %c0_14], %12 {strides = array<i32>} : memref<12x8x128xf32, #tpu.memory_space<vmem>>, vector<4x8x128xf32>,
    %c0_15 = arith.constant 0 : index
    %c0_16 = arith.constant 0 : index
    %14 = vector.load %arg3[%c0_15, %c0_16] : memref<8x12xf32, #tpu.memory_space<vmem>>, vector<8x12xf32>
    %c0_17 = arith.constant 0 : index
    %c0_18 = arith.constant 0 : index
    %c0_19 = arith.constant 0 : index
    %15 = vector.load %arg6[%c0_17, %c0_18, %c0_19] : memref<12x8x128xf32, #tpu.memory_space<vmem>>, vector<12x8x128xf32>
    "tpu.trace_start"() <{level = 10 : i32, message = "ok,kbn->obn"}> : () -> ()
    %cst_20 = arith.constant dense<0.000000e+00> : vector<8x8x128xf32>
    %16 = tpu.matmul %14, %15, %cst_20 {dimension_numbers = #tpu.dot_dimension_numbers<[1], [0], [0], [1, 2], [0, 0, 1, 1, 1, 2], [], []>} : vector<8x12xf32>, vector<12x8x128xf32>, vector<8x8x128xf32> -> vector<8x8x128xf32>
    "tpu.trace_stop"() : () -> ()
    %c0_21 = arith.constant 0 : index
    %c0_22 = arith.constant 0 : index
    %c0_23 = arith.constant 0 : index
    %17 = vector.load %arg4[%c0_21, %c0_22, %c0_23] : memref<8x1x1xf32, #tpu.memory_space<vmem>>, vector<8x1x1xf32>
    %18 = vector.broadcast %17 : vector<8x1x1xf32> to vector<8x8x128xf32>
    %19 = arith.addf %16, %18 : vector<8x8x128xf32>
    %c0_24 = arith.constant 0 : index
    %c0_25 = arith.constant 0 : index
    %c0_26 = arith.constant 0 : index
    %20 = vector.load %arg5[%c0_24, %c0_25, %c0_26] : memref<8x8x128xf32, #tpu.memory_space<vmem>>, vector<8x8x128xf32>
    tpu.vector_store %arg5[%c0_24, %c0_25, %c0_26], %19 {strides = array<i32>} : memref<8x8x128xf32, #tpu.memory_space<vmem>>, vector<8x8x128xf32>,
    return
  }
  func.func @transform_0(%arg0: i32) -> (i32, i32, i32) {
    %c0_i32 = arith.constant 0 : i32
    %c0_i32_0 = arith.constant 0 : i32
    %c0_i32_1 = arith.constant 0 : i32
    return %c0_i32, %arg0, %c0_i32_0 : i32, i32, i32
  }
  func.func @transform_1(%arg0: i32) -> (i32, i32, i32) {
    %c0_i32 = arith.constant 0 : i32
    %c0_i32_0 = arith.constant 0 : i32
    %c0_i32_1 = arith.constant 0 : i32
    %c0_i32_2 = arith.constant 0 : i32
    return %c0_i32, %c0_i32_0, %c0_i32_1 : i32, i32, i32
  }
  func.func @transform_2(%arg0: i32) -> (i32, i32) {
    %c0_i32 = arith.constant 0 : i32
    %c0_i32_0 = arith.constant 0 : i32
    %c0_i32_1 = arith.constant 0 : i32
    return %c0_i32, %c0_i32_0 : i32, i32
  }
  func.func @transform_3(%arg0: i32) -> (i32, i32, i32) {
    %c0_i32 = arith.constant 0 : i32
    %c0_i32_0 = arith.constant 0 : i32
    %c0_i32_1 = arith.constant 0 : i32
    %c0_i32_2 = arith.constant 0 : i32
    return %c0_i32, %c0_i32_0, %c0_i32_1 : i32, i32, i32
  }
  func.func @transform_4(%arg0: i32) -> (i32, i32, i32) {
    %c0_i32 = arith.constant 0 : i32
    %c0_i32_0 = arith.constant 0 : i32
    %c0_i32_1 = arith.constant 0 : i32
    return %c0_i32, %arg0, %c0_i32_0 : i32, i32, i32
  }
}

</mosaic_0001>

<bundles_post_ra>
// kernel: tpu_custom_call.1
= control target key start
LH: loop header
LB: loop body
LE: loop exit
PB: predicated region body
PF: predicated region fallthrough
CT: control target
= control target key end

     0   :  { %9 = vsyncpa [#allocation4], 0  ;;  %s2278_s0 = inlined_call_operand.hbm [shape: f32[4,16,128], index: 0, kind: input, shape index: {}]   ;;  %s2279_s1 = inlined_call_operand.hbm [shape: f32[2,128,128], index: 1, kind: input, shape index: {}]   ;;  %s2280_s2 = inlined_call_operand.vmem [shape: f32[8,12], index: 2, kind: input, shape index: {}]   ;;  %s2281_s3 = inlined_call_operand.vmem [shape: f32[8,1,1], index: 3, kind: input, shape index: {}]   ;;  %s2282_s4 = inlined_call_operand.hbm [shape: f32[8,16,128], index: 4, kind: output, shape index: {}]  }
   0x1   :  { %11 = vsyncpa [#allocation4 + $0x1], 0 }
   0x2   :  { %12 = vsyncpa [#allocation7], 0 }
   0x3   :  { %13 = vsyncpa [#allocation5], 0 }
   0x4   :  { %15 = vsyncpa [#allocation5 + $0x1], 0  ;;  %s1918_s15 = smov 0   ;;  %s1920_s16 = smov 0  }
   0x5   :  { %s1922_s17 = smov 0   ;;  %s1924_s18 = smov 0  }
   0x6 LB: > { %s1939_s19 = sadd.s32 4294967295, %s1877_s18   ;;  %s1437_s20 = sadd.s32 4294967294, %s1877_s18   ;;  %s1877_s18 = sphi %s1924_s18, %s2308_s18   ;;  %s1873_s17 = sphi %s1922_s17, %s2307_s17   ;;  %s1869_s16 = sphi %s1920_s16, %s2306_s16   ;;  %s1865_s15 = sphi %s1918_s15, %s2305_s15  }
   0x7   : > { %s1943_s21 = sadd.s32 1, %s1877_s18   ;;  %s28_s22 = sadd.s32 1, %s1873_s17 }
   0x8   : > { %s25_s23 = ssub.s32 %s1877_s18, %s1943_s21  ;;  %p35_p0 = scmp.ne.s32.totalorder %s1873_s17, %s1869_s16 }
   0x9   : > { %p26_p1 = scmp.eq.s32.totalorder %s25_s23, 0  ;;  %p36_p2 = scmp.eq.s32.totalorder %s1877_s18, 0 }
   0xa   : > { %p41_p3 = scmp.ne.s32.totalorder %s1869_s16, %s1865_s15  ;;  %p2283_p4 = scmp.eq.s32.totalorder %s1939_s19, 0 }
   0xb   : > { %s1955_s24 = scalar_select %p26_p1, %s1873_s17, %s28_s22  }
   0xc   : > { %p1957_p5 = por %p36_p2, %p35_p0  ;;  %p1963_p6 = por %p2283_p4, %p41_p3 }
   0xd   : > { %p128_p7 = scmp.eq.s32.totalorder %s1939_s19, 1  ;;  %p134_p8 = scmp.eq.s32.totalorder %s1437_s20, 1 }
   0xe   : > { %s2287_s25 = scalar_select %p1957_p5, 1, 0 }
   0xf   : > { %s2288_s26 = scalar_select %p1963_p6, 1, 0 }
  0x10   : > { %p1438_p9 = scmp.ge.s32.totalorder %s1877_s18, 1  ;;  %p141_p10 = scmp.lt.s32.totalorder %s1877_s18, 3 }
  0x11   : > { %p1970_p11 = por %p128_p7, %p35_p0  ;;  %p1974_p12 = por %p134_p8, %p41_p3 }
  0x12   : > { %p1978_p13 = pnand %p1438_p9, %p141_p10  ;;  %s1879_s30 = smov [#allocation6]  }
  0x13   : > { %s2289_s27 = scalar_select %p1970_p11, 1, 0 }
  0x14   : > { %s2290_s28 = scalar_select %p1974_p12, 1, 0 }
  0x15   : > { %s2291_s29 = scalar_select %p1978_p13, 1, 0 }
  0x16   : > { %p1683_p1 = pneg %p1978_p13  ;;  %s153_s5 = sshll.u32 %s1879_s30, 4  ;;  %s154_s5 = int_to_ptr.vmem [resolvable:$true] %s153_s5 }
  0x17   : > { %s173_s7 = sand.u32 1, %s1873_s17   ;;  %s1749_s10 = scalar_lea.hbm %s2279_s1, 4096 }
  0x18   : > { %p1986_p2 = pnand %p1683_p1, %p2283_p4  ;;  %p1750_p7 = scmp.ne.s32.totalorder %s2279_s1, %s1749_s10 }
  0x19   : > { %p1756_p1 = scmp.lt.u32.totalorder %s1749_s10, %s2279_s1 }
  0x1a   : > { %p1751_p8 = pneg %p1986_p2 }
  0x1c   : > { %p1752_p9 = pnand %p1751_p8, %p1750_p7 }
  0x1e   : > { %p1753_p10 = pneg %p1752_p9 }
  0x20   : > { %p1758_p4 = pnand %p1756_p1, %p1753_p10 }
  0x22   : > { %1761 = shalt.err (!%p1758_p4)
}
  0x23   : > { %s1762_s20 = scalar_lea.vmem %s154_s5, 4096  ;;  %p1770_p11 = scmp.lt.s32.totalorder %s154_s5, %s154_s5 }
  0x24   : > { %p1763_p0 = scmp.ne.s32.totalorder %s154_s5, %s1762_s20  ;;  %p1771_p6 = scmp.lt.s32.totalorder %s1762_s20, %s1762_s20 }
  0x26   : > { %p1765_p3 = pnand %p1763_p0, %p1751_p8  ;;  %p1772_p13 = por %p1771_p6, %p1770_p11 }
  0x28   : > { %p1766_p12 = pneg %p1765_p3 }
  0x2a   : > { %p1773_p5 = pnand %p1772_p13, %p1766_p12 }
  0x2c   : > { %1776 = shalt.err (!%p1773_p5)
}
  0x2d   : > { %s1880_s22 = smov 128   ;;  %s1881_s23 = smov 8  }
  0x2e   : > { %1686 = dma.hbm_to_vmem [thread:$0]  (!%p1986_p2), %s2279_s1, 4096, %s154_s5, [#allocation7], %s1880_s22, %s1880_s22, %s1881_s23  }
  0x2f   : > { %p2293_p4 = scmp.ne.s32.totalorder %s2287_s25, 0  ;;  %p2294_p0 = scmp.lt.s32.totalorder %s1877_s18, 2 }
  0x30   : > { %s1441_s10 = sshll.u32 %s173_s7, 5  ;;  %s1442_s11 = sshll.u32 %s1877_s18, 7 }
  0x31   : > { %p2016_p3 = pnand %p2294_p0, %p2293_p4  ;;  %s2024_s6 = scalar_lea.hbm %s2278_s0, %s1442_s11 }
  0x32   : > { %s177_s5 = scalar_lea.vmem [#allocation3], %s1441_s10  ;;  %s2028_s14 = scalar_lea.sflag [#allocation4], %s173_s7 }
  0x33   : > { %s183_s25 = sshll.u32 %s177_s5, 4  ;;  %s1777_s20 = scalar_lea.hbm %s2024_s6, 512  ;;  %s2026_s25 = int_to_ptr.vmem [resolvable:$true] %s183_s25 }
  0x34   : > { %p1778_p5 = scmp.ne.s32.totalorder %s2024_s6, %s1777_s20  ;;  %p1779_p6 = pneg %p2016_p3 }
  0x35   : > { %s1782_s11 = scalar_lea.hbm %s2278_s0, 1024  ;;  %p1783_p13 = scmp.lt.u32.totalorder %s2024_s6, %s2278_s0 }
  0x36   : > { %p1780_p11 = pnand %p1779_p6, %p1778_p5  ;;  %p1784_p2 = scmp.lt.u32.totalorder %s1782_s11, %s1777_s20 }
  0x37   : > { %p1786_p8 = scmp.lt.u32.totalorder %s1777_s20, %s2024_s6 }
  0x38   : > { %p1781_p12 = pneg %p1780_p11  ;;  %p1785_p7 = por %p1784_p2, %p1783_p13 }
  0x3a   : > { %p1787_p9 = por %p1786_p8, %p1785_p7 }
  0x3c   : > { %p1788_p10 = pnand %p1787_p9, %p1781_p12 }
  0x3e   : > { %1791 = shalt.err (!%p1788_p10)
}
  0x3f   : > { %s1792_s7 = scalar_lea.vmem %s2026_s25, 512  ;;  %s1882_s10 = smov [#allocation3]  }
  0x40   : > { %p1793_p1 = scmp.ne.s32.totalorder %s2026_s25, %s1792_s7  ;;  %s1797_s5 = sshll.u32 %s1882_s10, 4  ;;  %s1798_s5 = int_to_ptr.vmem [resolvable:$false] %s1797_s5 }
  0x41   : > { %s1799_s30 = scalar_lea.vmem %s1798_s5, 1024  ;;  %p1800_p5 = scmp.lt.s32.totalorder %s2026_s25, %s1798_s5 }
  0x42   : > { %p1795_p4 = pnand %p1793_p1, %p1779_p6  ;;  %p1801_p11 = scmp.lt.s32.totalorder %s1799_s30, %s1792_s7 }
  0x44   : > { %p1796_p0 = pneg %p1795_p4  ;;  %p1802_p13 = por %p1801_p11, %p1800_p5 }
  0x46   : > { %p1803_p2 = pnand %p1802_p13, %p1796_p0 }
  0x48   : > { %1806 = shalt.err (!%p1803_p2)
}
  0x49   : > { %s1883_s20 = smov 256   ;;  %p2296_p6 = scmp.ne.s32.totalorder %s2291_s29, 0 }
  0x4a   : > { %1690 = dma.hbm_to_vmem [thread:$0]  (!%p2016_p3), %s2024_s6, 512, %s2026_s25, %s2028_s14, %s1883_s20, %s1880_s22, %s1881_s23  }
  0x4b   : > { %195 = sbr.rel (%p2296_p6) target bundleno = 604 (0x25c), region = 36  ;;  %s2061_s8 = sand.u32 (!%p2296_p6), 1, %s1869_s16  }
  0x4c   : > { %s1444_s11 = sshll.u32 (!%p2296_p6), %s2061_s8, 5  ;;  %s198_s12 = scalar_lea.sflag (!%p2296_p6), [#allocation4], %s2061_s8 }
  0x4d   : > { %s2065_s13 = scalar_lea.vmem (!%p2296_p6), [#allocation3], %s1444_s11  ;;  %p2297_p12 = scmp.ne.s32.totalorder (!%p2296_p6), %s2288_s26, 0 }
  0x52   : > { %1852 = dma.done.wait (%p2297_p12), %s198_s12, 512  }
  0x53   : > { %1854 = vsyncadd (%p2297_p12), %s198_s12, 4294966784  ;;  %p2298_p3 = scmp.eq.s32.totalorder %s1939_s19, 0 }
  0x55   : > { %1856 = dma.done.wait (%p2298_p3), [#allocation7], 4096   ;;  %p2299_p7 = pmov %p2298_p3 }
  0x56   : > { %v238_v0 = vld [vmem:[#allocation6] sm:$0xff]  ;;  %v239_v1 = vld [vmem:[#allocation6 + $0x8] sm:$0xff]  ;;  %v240_v5 = vld [vmem:[#allocation6 + $0x10] sm:$0xff]  ;;  %v1884_v12 = vmov 1983009808   ;;  %v549_v14 = vlaneseq  ;;  %vm888_vm0 = vcmask 1043456  }
  0x57   : > { %1858 = vsyncadd (%p2299_p7), [#allocation7], 4294963200  ;;  %v345_v2 = vld [vmem:[#allocation6 + $0x80] sm:$0xff]  ;;  %v1587_v3 = vpack.c.bf16 %v239_v1, %v238_v0  ;;  %v346_v4 = vld [vmem:[#allocation6 + $0x88] sm:$0xff]  ;;  %v547_v13 = vunpack.c.l.s4 %v1884_v12  ;;  %vm1888_vm1 = vmmov 1   ;;  %vm884_vm3 = vcmask 97280  }
  0x58   : > { %v241_v6 = vld [vmem:[#allocation6 + $0x18] sm:$0xff]  ;;  %v1619_v7 = vpack.c.bf16 %v346_v4, %v345_v2  ;;  %v347_v9 = vld [vmem:[#allocation6 + $0x90] sm:$0xff]  ;;  %v242_v11 = vld [vmem:[#allocation6 + $0x20] sm:$0xff]  ;;  %v2075_v24 = vshrl.u32 %v549_v14, 7  ;;  %s1446_s22 = sshll.u32 %s2061_s8, 6  ;;  %s1468_s6 = sshll.u32 %s1939_s19, 7 }
  0x59   : > { %v1591_v8 = vpack.c.bf16 %v241_v6, %v240_v5  ;;  %v348_v10 = vld [vmem:[#allocation6 + $0x98] sm:$0xff]  ;;  %1588 = vmatprep.subr.bf16.mxu0 %v1587_v3  ;;  %v243_v16 = vld [vmem:[#allocation6 + $0x28] sm:$0xff]  ;;  %v349_v17 = vld [vmem:[#allocation6 + $0xa0] sm:$0xff]  ;;  %v548_v23 = vunpack.c.0.s8 %v547_v13  ;;  %v1885_v6 = vmov 0.0   ;;  %s229_s23 = scalar_lea.vmem [#allocation8], %s1446_s22  ;;  %s2234_s14 = scalar_lea.hbm %s2282_s4, %s1468_s6 }
  0x5a   : > { %v1623_v15 = vpack.c.bf16 %v348_v10, %v347_v9  ;;  %v350_v18 = vld [vmem:[#allocation6 + $0xa8] sm:$0xff]  ;;  %1620 = vmatprep.subr.bf16.mxu1 %v1619_v7  ;;  %1590 = vmatpush3.bf16.msra.mxu0 %v1587_v3  ;;  %v1595_v19 = vpack.c.bf16 %v243_v16, %v242_v11  ;;  %v244_v21 = vld [vmem:[#allocation6 + $0x30] sm:$0xff]  ;;  %v245_v22 = vld [vmem:[#allocation6 + $0x38] sm:$0xff]  ;;  %v1886_v9 = vmov 0   ;;  %v1887_v16 = vmov 1934713408  }
  0x5b   : > { %1622 = vmatpush3.bf16.msra.mxu1 %v1619_v7  ;;  %1592 = vmatprep.subr.bf16.mxu0 %v1591_v8  ;;  %v1627_v20 = vpack.c.bf16 %v350_v18, %v349_v17  ;;  %v351_v25 = vld [vmem:[#allocation6 + $0xb0] sm:$0xff]  ;;  %v352_v26 = vld [vmem:[#allocation6 + $0xb8] sm:$0xff]  ;;  %v1599_v27 = vpack.c.bf16 %v245_v22, %v244_v21  ;;  %v246_v28 = vld [vmem:[#allocation6 + $0x40] sm:$0xff]  ;;  %v2079_v34 = vsub.s32 %v548_v23, %v2075_v24  ;;  %v611_v17 = vunpack.c.l.s4 %v1887_v16  ;;  %s1354_s9 = sshll.u32 %s229_s23, 4  ;;  %s1342_s7 = scalar_lea.sflag [#allocation5], %s2061_s8  ;;  %s2229_s9 = int_to_ptr.vmem [resolvable:$true] %s1354_s9 }
  0x5c   : > { %1624 = vmatprep.subr.bf16.mxu1 %v1623_v15  ;;  %v247_v29 = vld [vmem:[#allocation6 + $0x48] sm:$0xff]  ;;  %v1631_v30 = vpack.c.bf16 %v352_v26, %v351_v25  ;;  %v353_v31 = vld [vmem:[#allocation6 + $0xc0] sm:$0xff]  ;;  %v232_v36 = vld [vmem:[%s2065_s13 + $0x10] sm:$0xff]  ;;  %1744 = vset.pattern.permute.xlu1 %v1886_v9  ;;  %s1807_s10 = scalar_lea.vmem %s2229_s9, 1024  ;;  %p2302_p9 = scmp.ne.s32.totalorder %s2289_s27, 0 }
  0x5d   : > { %v354_v32 = vld [vmem:[#allocation6 + $0xc8] sm:$0xff]  ;;  %v230_v33 = vld [vmem:[%s2065_s13] sm:$0xff]  ;;  %v233_v37 = vld [vmem:[%s2065_s13 + $0x18] sm:$0xff]  ;;  %v1603_v42 = vpack.c.bf16 %v247_v29, %v246_v28  ;;  %1743 = vset.pattern.permute.xlu0 %v1886_v9  ;;  %v612_v18 = vunpack.c.0.s8 %v611_v17  ;;  %p1808_p8 = scmp.ne.s32.totalorder %s2229_s9, %s1807_s10  ;;  %s1889_s5 = smov [#allocation8]  }
  0x5e   : > { %1594 = vmatpush3.bf16.msra.mxu0 %v1591_v8  ;;  %1543 = vmatprep.mubr.f32.mxu0 %v230_v33  ;;  %v231_v35 = vld [vmem:[%s2065_s13 + $0x8] sm:$0xff]  ;;  %v544_v38 = vcombine.low %v230_v33, %v232_v36  ;;  %v545_v39 = vcombine.high %v230_v33, %v232_v36  ;;  %v1635_v43 = vpack.c.bf16 %v354_v32, %v353_v31  ;;  %v248_v44 = vld [vmem:[#allocation6 + $0x50] sm:$0xff]  ;;  %v249_v45 = vld [vmem:[#allocation6 + $0x58] sm:$0xff]  ;;  %s1811_s30 = sshll.u32 %s1889_s5, 4  ;;  %s1812_s30 = int_to_ptr.vmem [resolvable:$false] %s1811_s30 }
  0x5f   : > { %1626 = vmatpush3.bf16.msra.mxu1 %v1623_v15  ;;  %1596 = vmatprep.subr.bf16.mxu0 %v1595_v19  ;;  %v560_v40 = vcombine.low %v231_v35, %v233_v37  ;;  %v561_v41 = vcombine.high %v231_v35, %v233_v37  ;;  %v355_v50 = vld [vmem:[#allocation6 + $0xd0] sm:$0xff]  ;;  %v356_v51 = vld [vmem:[#allocation6 + $0xd8] sm:$0xff]  ;;  %v1607_v56 = vpack.c.bf16 %v249_v45, %v248_v44  ;;  %v250_v58 = vld [vmem:[#allocation6 + $0x60] sm:$0xff]  ;;  %p1809_p10 = pnand %p1808_p8, %p2302_p9  ;;  %s1813_s20 = scalar_lea.vmem %s1812_s30, 2048 }
  0x60   : > { %1628 = vmatprep.subr.bf16.mxu1 %v1627_v20  ;;  %1581 = vmatprep.mubr.f32.mxu1 %v230_v33  ;;  %v2085_v46 = vrot.slane %v544_v38, %v2079_v34  ;;  %v2088_v47 = vrot.slane %v545_v39, %v2079_v34  ;;  %v1639_v57 = vpack.c.bf16 %v356_v51, %v355_v50  ;;  %v251_v59 = vld [vmem:[#allocation6 + $0x68] sm:$0xff]  ;;  %v357_v60 = vld [vmem:[#allocation6 + $0xe0] sm:$0xff]  ;;  %v252_v0 = vld [vmem:[#allocation6 + $0x70] sm:$0xff]  ;;  %p1814_p4 = scmp.lt.s32.totalorder %s2229_s9, %s1812_s30  ;;  %p1815_p0 = scmp.lt.s32.totalorder %s1813_s20, %s1807_s10 }
  0x61   : > { %v2091_v48 = vrot.slane %v560_v40, %v2079_v34  ;;  %v2094_v49 = vrot.slane %v561_v41, %v2079_v34  ;;  %v358_v61 = vld [vmem:[#allocation6 + $0xe8] sm:$0xff]  ;;  %v1611_v62 = vpack.c.bf16 %v251_v59, %v250_v58  ;;  %v253_v1 = vld [vmem:[#allocation6 + $0x78] sm:$0xff]  ;;  %v359_v2 = vld [vmem:[#allocation6 + $0xf0] sm:$0xff]  ;;  %p1810_p1 = pneg %p1809_p10 }
  0x62   : > { %1598 = vmatpush3.bf16.msra.mxu0 %v1595_v19  ;;  %v1643_v63 = vpack.c.bf16 %v358_v61, %v357_v60  ;;  %v360_v3 = vld [vmem:[#allocation6 + $0xf8] sm:$0xff]  ;;  %v1615_v4 = vpack.c.bf16 %v253_v1, %v252_v0  ;;  %v1449_v7 = vld [vmem:[%s2281_s3 + $0x2] ss:$0 sm:$0xff]  ;;  %v1447_v8 = vld [vmem:[%s2281_s3] ss:$0 sm:$0xff]  ;;  %p1816_p5 = por %p1815_p0, %p1814_p4 }
  0x63   : > { %1630 = vmatpush3.bf16.msra.mxu1 %v1627_v20  ;;  %1600 = vmatprep.subr.bf16.mxu0 %v1599_v27  ;;  %v608_v52 = vcombine.low %v2085_v46, %v2091_v48  ;;  %v609_v53 = vcombine.high %v2085_v46, %v2091_v48  ;;  %v624_v54 = vcombine.low %v2088_v47, %v2094_v49  ;;  %v1450_v10 = vld [vmem:[%s2281_s3 + $0x3] ss:$0 sm:$0xff]  ;;  %v1448_v11 = vld [vmem:[%s2281_s3 + $0x1] ss:$0 sm:$0xff]  ;;  %v1452_v12 = vld [vmem:[%s2281_s3 + $0x5] ss:$0 sm:$0xff] }
  0x64   : > { %1632 = vmatprep.subr.bf16.mxu1 %v1631_v30  ;;  %v625_v55 = vcombine.high %v2088_v47, %v2094_v49  ;;  %v1647_v5 = vpack.c.bf16 %v360_v3, %v359_v2  ;;  %521 = vperm.xlu1 %1744, %v1449_v7   ;;  %v1451_v13 = vld [vmem:[%s2281_s3 + $0x4] ss:$0 sm:$0xff]  ;;  %v1454_v14 = vld [vmem:[%s2281_s3 + $0x7] ss:$0 sm:$0xff]  ;;  %v1453_v15 = vld [vmem:[%s2281_s3 + $0x6] ss:$0 sm:$0xff]  ;;  %v2131_v20 = vsub.s32 %v612_v18, %v2075_v24  ;;  %p1817_p11 = pnand %p1816_p5, %p1810_p1 }
  0x65   : > { %513 = vperm.xlu0 %1743, %v1447_v8   ;;  %vm2168_vm2 = vmpackc.low %vm888_vm0, %vm1888_vm1 }
  0x66   : > { %1602 = vmatpush3.bf16.msra.mxu0 %v1599_v27  ;;  %v616_v26 = vrot.slane %v608_v52, %v2131_v20  ;;  %v623_v27 = vrot.slane %v609_v53, %v2131_v20  ;;  %v632_v24 = vrot.slane %v624_v54, %v2131_v20  ;;  %v639_v32 = vrot.slane %v625_v55, %v2131_v20 }
  0x67   : > { %1634 = vmatpush3.bf16.msra.mxu1 %v1631_v30  ;;  %1604 = vmatprep.subr.bf16.mxu0 %v1603_v42 }
  0x68   : > { %1636 = vmatprep.subr.bf16.mxu1 %v1635_v43  ;;  %525 = vperm.xlu1 %1744, %v1450_v10  }
  0x69   : > { %517 = vperm.xlu0 %1743, %v1448_v11  }
  0x6a   : > { %1606 = vmatpush3.bf16.msra.mxu0 %v1603_v42 }
  0x6b   : > { %1638 = vmatpush3.bf16.msra.mxu1 %v1635_v43  ;;  %1608 = vmatprep.subr.bf16.mxu0 %v1607_v56 }
  0x6c   : > { %1640 = vmatprep.subr.bf16.mxu1 %v1639_v57  ;;  %533 = vperm.xlu1 %1744, %v1452_v12  }
  0x6d   : > { %529 = vperm.xlu0 %1743, %v1451_v13  }
  0x6e   : > { %1610 = vmatpush3.bf16.msra.mxu0 %v1607_v56 }
  0x6f   : > { %1642 = vmatpush3.bf16.msra.mxu1 %v1639_v57  ;;  %1612 = vmatprep.subr.bf16.mxu0 %v1611_v62 }
  0x70   : > { %1644 = vmatprep.subr.bf16.mxu1 %v1643_v63  ;;  %541 = vperm.xlu1 %1744, %v1454_v14  }
  0x71   : > { %537 = vperm.xlu0 %1743, %v1453_v15  }
  0x72   : > { %1614 = vmatpush3.bf16.msra.mxu0 %v1611_v62 }
  0x73   : > { %1646 = vmatpush3.bf16.msra.mxu1 %v1643_v63  ;;  %1616 = vmatprep.subr.bf16.mxu0 %v1615_v4 }
  0x74   : > { %1648 = vmatprep.subr.bf16.mxu1 %v1647_v5 }
  0x76   : > { %1618 = vmatpush3.bf16.msra.mxu0 %v1615_v4 }
  0x77   : > { %1650 = vmatpush3.bf16.msra.mxu1 %v1647_v5 }
  0x79   : > { %1544 = vmatmul.mubr.f32.vlgmr.msra.gmra.mrb[0].mxu0 %v231_v35 }
  0x7a   : > { %1582 = vmatmul.mubr.f32.vlgmr.msra.gmra.mrb[0].mxu1 %v231_v35  ;;  %1546 = vmatprep.mubr.f32.mxu0 %v232_v36 }
  0x7b   : > { %1584 = vmatprep.mubr.f32.mxu1 %v232_v36 }
  0x7d   : > { %1547 = vmatmul.mubr.f32.gmra.mrb[2].mxu0 %v233_v37 }
  0x7e   : > { %1585 = vmatmul.mubr.f32.gmra.mrb[2].mxu1 %v233_v37  ;;  %977 = vmatprep.mubr.f32.mxu0 %v1885_v6 }
  0x7f   : > { %1048 = vmatprep.mubr.f32.mxu1 %v1885_v6 }
 0x14c   : > { %v1545_v19 = vpop.f32.mrb[0].mxu0 }
 0x14d   : > { %v1583_v21 = vpop.f32.mrb[0].mxu1  ;;  %v320_v22 = vpop.f32.mrb[1].mxu0 }
 0x14e   : > { %v427_v23 = vpop.f32.mrb[1].mxu1 }
 0x150   : > { %v1548_v25 = vpop.f32.mrb[2].mxu0 }
 0x151   : > { %v592_v28 = vcombine.low %v1545_v19, %v1548_v25  ;;  %v593_v29 = vcombine.high %v1545_v19, %v1548_v25  ;;  %v1586_v30 = vpop.f32.mrb[2].mxu1  ;;  %v330_v31 = vpop.f32.mrb[3].mxu0  ;;  %v451_v25 = vld [vmem:[%s2280_s2] sm:$0xff] }
 0x152   : > { %v696_v33 = vcombine.low %v1583_v21, %v1586_v30  ;;  %v697_v35 = vcombine.high %v1583_v21, %v1586_v30  ;;  %v576_v36 = vcombine.low %v320_v22, %v330_v31  ;;  %v577_v37 = vcombine.high %v320_v22, %v330_v31  ;;  %v437_v38 = vpop.f32.mrb[3].mxu1 }
 0x153   : > { %v600_v39 = vrot.slane %v592_v28, %v2079_v34  ;;  %v607_v40 = vrot.slane %v593_v29, %v2079_v34  ;;  %v680_v41 = vcombine.low %v427_v23, %v437_v38  ;;  %v681_v42 = vcombine.high %v427_v23, %v437_v38 }
 0x154   : > { %v704_v43 = vrot.slane %v696_v33, %v2079_v34  ;;  %v711_v44 = vrot.slane %v697_v35, %v2079_v34  ;;  %v584_v45 = vrot.slane %v576_v36, %v2079_v34  ;;  %v591_v46 = vrot.slane %v577_v37, %v2079_v34 }
 0x155   : > { %v688_v47 = vrot.slane %v680_v41, %v2079_v34  ;;  %v695_v48 = vrot.slane %v681_v42, %v2079_v34 }
 0x156   : > { %v640_v49 = vcombine.low %v584_v45, %v600_v39  ;;  %v641_v50 = vcombine.high %v584_v45, %v600_v39  ;;  %v656_v51 = vcombine.low %v591_v46, %v607_v40  ;;  %v657_v52 = vcombine.high %v591_v46, %v607_v40 }
 0x157   : > { %v712_v53 = vcombine.low %v688_v47, %v704_v43  ;;  %v713_v54 = vcombine.high %v688_v47, %v704_v43  ;;  %v728_v55 = vcombine.low %v695_v48, %v711_v44  ;;  %v729_v56 = vcombine.high %v695_v48, %v711_v44 }
 0x158   : > { %v648_v57 = vrot.slane %v640_v49, %v2131_v20  ;;  %v655_v58 = vrot.slane %v641_v50, %v2131_v20  ;;  %v664_v59 = vrot.slane %v656_v51, %v2131_v20  ;;  %v671_v60 = vrot.slane %v657_v52, %v2131_v20 }
 0x159   : > { %v720_v61 = vrot.slane %v712_v53, %v2131_v20  ;;  %v727_v62 = vrot.slane %v713_v54, %v2131_v20  ;;  %v736_v63 = vrot.slane %v728_v55, %v2131_v20  ;;  %v743_v0 = vrot.slane %v729_v56, %v2131_v20 }
 0x15a   : > { %v672_v1 = vcombine.low %v616_v26, %v648_v57  ;;  %v674_v2 = vcombine.low %v623_v27, %v655_v58  ;;  %v676_v3 = vcombine.low %v632_v24, %v664_v59  ;;  %v678_v4 = vcombine.low %v639_v32, %v671_v60 }
 0x15b   : > { %v673_v5 = vcombine.high %v616_v26, %v648_v57  ;;  %v744_v7 = vcombine.high %v720_v61, %v1885_v6  ;;  %v675_v8 = vcombine.high %v623_v27, %v655_v58  ;;  %v745_v9 = vcombine.high %v727_v62, %v1885_v6  ;;  %v522_v26 = vpop.permute.xlu1 %521  ;;  %v514_v27 = vpop.permute.xlu0 %513 }
 0x15c   : > { %v1654_v10 = vpack.c.bf16 %v720_v61, %v672_v1  ;;  %v1660_v11 = vpack.c.bf16 %v727_v62, %v674_v2  ;;  %v1666_v12 = vpack.c.bf16 %v736_v63, %v676_v3  ;;  %v1672_v13 = vpack.c.bf16 %v743_v0, %v678_v4 }
 0x15d   : > { %v1651_v15 = vpack.c.bf16 %v744_v7, %v673_v5  ;;  %v1657_v16 = vpack.c.bf16 %v745_v9, %v675_v8  ;;  %v677_v17 = vcombine.high %v632_v24, %v664_v59  ;;  %v746_v18 = vcombine.high %v736_v63, %v1885_v6 }
 0x15e   : > { %v679_v19 = vcombine.high %v639_v32, %v671_v60  ;;  %v747_v21 = vcombine.high %v743_v0, %v1885_v6  ;;  %v748_v33 = vcombine.low %v514_v27, %v522_v26  ;;  %v749_v38 = vcombine.high %v514_v27, %v522_v26 }
 0x15f   : > { %1653 = vmatprep.subr.msk.bf16.mxu0 %vm2168_vm2, %v1651_v15  ;;  %1659 = vmatprep.subr.msk.bf16.mxu1 %vm2168_vm2, %v1657_v16  ;;  %v1663_v22 = vpack.c.bf16 %v746_v18, %v677_v17  ;;  %v526_v28 = vpop.permute.xlu1 %525  ;;  %v518_v29 = vpop.permute.xlu0 %517 }
 0x160   : > { %1656 = vmatpush1.bf16.msk.msra.mxu0 %vm2168_vm2, %v1654_v10  ;;  %1662 = vmatpush1.bf16.msk.msra.mxu1 %vm2168_vm2, %v1660_v11  ;;  %v1669_v23 = vpack.c.bf16 %v747_v21, %v679_v19  ;;  %v764_v35 = vcombine.low %v518_v29, %v526_v28  ;;  %v756_v39 = vrot.slane %v748_v33, %v2079_v34 }
 0x161   : > { %1665 = vmatprep.subr.msk.bf16.mxu0 %vm2168_vm2, %v1663_v22  ;;  %v765_v40 = vcombine.high %v518_v29, %v526_v28  ;;  %v763_v45 = vrot.slane %v749_v38, %v2079_v34 }
 0x162   : > { %1671 = vmatprep.subr.msk.bf16.mxu1 %vm2168_vm2, %v1669_v23 }
 0x163   : > { %1457 = vmatmul.mubr.msk.f32.vlgmr.msra.gmra.mrb[4].mxu0 %vm884_vm3, %v451_v25  ;;  %1460 = vmatmul.mubr.msk.f32.vlgmr.msra.gmra.mrb[4].mxu1 %vm884_vm3, %v451_v25  ;;  %v534_v30 = vpop.permute.xlu1 %533  ;;  %v530_v31 = vpop.permute.xlu0 %529  ;;  %v779_v46 = vrot.slane %v765_v40, %v2079_v34 }
 0x164   : > { %1668 = vmatpush1.bf16.msk.msra.mxu0 %vm2168_vm2, %v1666_v12  ;;  %1674 = vmatpush1.bf16.msk.msra.mxu1 %vm2168_vm2, %v1672_v13 }
 0x165   : > { %1119 = vmatprep.mubr.f32.mxu0 %v1885_v6  ;;  %1190 = vmatprep.mubr.f32.mxu1 %v1885_v6  ;;  %v772_v6 = vrot.slane %v764_v35, %v2079_v34  ;;  %v828_v53 = vcombine.low %v763_v45, %v779_v46  ;;  %v829_v54 = vcombine.high %v763_v45, %v779_v46 }
 0x167   : > { %1463 = vmatmul.mubr.msk.f32.vlgmr.msra.gmra.mrb[6].mxu0 %vm884_vm3, %v451_v25  ;;  %1466 = vmatmul.mubr.msk.f32.vlgmr.msra.gmra.mrb[6].mxu1 %vm884_vm3, %v451_v25  ;;  %v542_v24 = vpop.permute.xlu1 %541  ;;  %v538_v32 = vpop.permute.xlu0 %537  ;;  %v812_v47 = vcombine.low %v756_v39, %v772_v6  ;;  %v813_v49 = vcombine.high %v756_v39, %v772_v6  ;;  %v836_v62 = vrot.slane %v828_v53, %v2131_v20 }
 0x168   : > { %v796_v36 = vcombine.low %v534_v30, %v542_v24  ;;  %v780_v37 = vcombine.low %v530_v31, %v538_v32  ;;  %v797_v43 = vcombine.high %v534_v30, %v542_v24  ;;  %v781_v44 = vcombine.high %v530_v31, %v538_v32 }
 0x169   : > { %v820_v55 = vrot.slane %v812_v47, %v2131_v20  ;;  %v827_v59 = vrot.slane %v813_v49, %v2131_v20  ;;  %v843_v1 = vrot.slane %v829_v54, %v2131_v20 }
 0x16a   : > { %v804_v41 = vrot.slane %v796_v36, %v2079_v34  ;;  %v788_v42 = vrot.slane %v780_v37, %v2079_v34  ;;  %v811_v50 = vrot.slane %v797_v43, %v2079_v34  ;;  %v795_v51 = vrot.slane %v781_v44, %v2079_v34 }
 0x16c   : > { %v844_v48 = vcombine.low %v788_v42, %v804_v41  ;;  %v845_v52 = vcombine.high %v788_v42, %v804_v41  ;;  %v860_v57 = vcombine.low %v795_v51, %v811_v50  ;;  %v861_v58 = vcombine.high %v795_v51, %v811_v50 }
 0x16e   : > { %v852_v56 = vrot.slane %v844_v48, %v2131_v20  ;;  %v859_v60 = vrot.slane %v845_v52, %v2131_v20  ;;  %v868_v0 = vrot.slane %v860_v57, %v2131_v20  ;;  %v875_v2 = vrot.slane %v861_v58, %v2131_v20 }
 0x170   : > { %v876_v61 = vcombine.low %v820_v55, %v852_v56  ;;  %v878_v63 = vcombine.low %v827_v59, %v859_v60  ;;  %v877_v5 = vcombine.high %v820_v55, %v852_v56  ;;  %v879_v7 = vcombine.high %v827_v59, %v859_v60 }
 0x171   : > { %v880_v16 = vcombine.low %v836_v62, %v868_v0  ;;  %v882_v17 = vcombine.low %v843_v1, %v875_v2  ;;  %v881_v23 = vcombine.high %v836_v62, %v868_v0  ;;  %v883_v25 = vcombine.high %v843_v1, %v875_v2 }
 0x236   : > { %v979_v3 = vpop.f32.mrb[4].mxu0  ;;  %v1050_v4 = vpop.f32.mrb[4].mxu1 }
 0x237   : > { %v980_v8 = vadd.f32 %v979_v3, %v876_v61  ;;  %v1051_v9 = vadd.f32 %v1050_v4, %v878_v63  ;;  %v981_v10 = vpop.f32.mrb[5].mxu0  ;;  %v1052_v11 = vpop.f32.mrb[5].mxu1 }
 0x238   : > { %v982_v12 = vadd.f32 %v981_v10, %v877_v5  ;;  %v1053_v13 = vadd.f32 %v1052_v11, %v879_v7 }
 0x239   : > { %v1197_v14 = vcombine.low %v980_v8, %v1051_v9  ;;  %v1198_v15 = vcombine.high %v980_v8, %v1051_v9 }
 0x23a   : > { %v1213_v18 = vcombine.low %v982_v12, %v1053_v13  ;;  %v1214_v19 = vcombine.high %v982_v12, %v1053_v13  ;;  %v1121_v21 = vpop.f32.mrb[6].mxu0  ;;  %v1192_v22 = vpop.f32.mrb[6].mxu1 }
 0x23b   : > { %v1205_v26 = vrot.slane %v1197_v14, %v2079_v34  ;;  %v1212_v27 = vrot.slane %v1198_v15, %v2079_v34  ;;  %v1122_v28 = vadd.f32 %v1121_v21, %v880_v16  ;;  %v1193_v29 = vadd.f32 %v1192_v22, %v882_v17  ;;  %v1123_v30 = vpop.f32.mrb[7].mxu0  ;;  %v1194_v31 = vpop.f32.mrb[7].mxu1 }
 0x23c   : > { %v1221_v24 = vrot.slane %v1213_v18, %v2079_v34  ;;  %v1228_v32 = vrot.slane %v1214_v19, %v2079_v34  ;;  %v1124_v33 = vadd.f32 %v1123_v30, %v881_v23  ;;  %v1195_v35 = vadd.f32 %v1194_v31, %v883_v25 }
 0x23d   : > { %v1229_v36 = vcombine.low %v1122_v28, %v1193_v29  ;;  %v1230_v37 = vcombine.high %v1122_v28, %v1193_v29 }
 0x23e   : > { %v1261_v38 = vcombine.low %v1205_v26, %v1221_v24  ;;  %v1262_v39 = vcombine.high %v1205_v26, %v1221_v24  ;;  %v1277_v40 = vcombine.low %v1212_v27, %v1228_v32  ;;  %v1278_v6 = vcombine.high %v1212_v27, %v1228_v32 }
 0x23f   : > { %v1237_v41 = vrot.slane %v1229_v36, %v2079_v34  ;;  %v1244_v42 = vrot.slane %v1230_v37, %v2079_v34  ;;  %v1245_v43 = vcombine.low %v1124_v33, %v1195_v35  ;;  %v1246_v44 = vcombine.high %v1124_v33, %v1195_v35 }
 0x240   : > { %v1269_v51 = vrot.slane %v1261_v38, %v2131_v20  ;;  %v1276_v52 = vrot.slane %v1262_v39, %v2131_v20  ;;  %v1292_v57 = vrot.slane %v1278_v6, %v2131_v20 }
 0x241   : > { %v1253_v45 = vrot.slane %v1245_v43, %v2079_v34  ;;  %v1260_v46 = vrot.slane %v1246_v44, %v2079_v34  ;;  %v1285_v34 = vrot.slane %v1277_v40, %v2131_v20 }
 0x243   : > { %v1293_v47 = vcombine.low %v1237_v41, %v1253_v45  ;;  %v1294_v48 = vcombine.high %v1237_v41, %v1253_v45  ;;  %v1309_v49 = vcombine.low %v1244_v42, %v1260_v46  ;;  %v1310_v50 = vcombine.high %v1244_v42, %v1260_v46 }
 0x245   : > { %v1301_v53 = vrot.slane %v1293_v47, %v2131_v20  ;;  %v1308_v54 = vrot.slane %v1294_v48, %v2131_v20  ;;  %v1317_v55 = vrot.slane %v1309_v49, %v2131_v20  ;;  %v1324_v56 = vrot.slane %v1310_v50, %v2131_v20 }
 0x247   : > { %v1325_v58 = vcombine.low %v1269_v51, %v1301_v53  ;;  %v1326_v59 = vcombine.high %v1269_v51, %v1301_v53  ;;  %v1327_v60 = vcombine.low %v1276_v52, %v1308_v54  ;;  %v1328_v61 = vcombine.high %v1276_v52, %v1308_v54 }
 0x248   : > { %v1329_v62 = vcombine.low %v1285_v34, %v1317_v55  ;;  %v1330_v63 = vcombine.high %v1285_v34, %v1317_v55  ;;  %v1331_v0 = vcombine.low %v1292_v57, %v1324_v56  ;;  %v1332_v1 = vcombine.high %v1292_v57, %v1324_v56 }
 0x249   : > { %1333 = vst [vmem:[%s229_s23] sm:$0xff] %v1325_v58  ;;  %1334 = vst [vmem:[%s229_s23 + $0x8] sm:$0xff] %v1326_v59 }
 0x24a   : > { %1335 = vst [vmem:[%s229_s23 + $0x10] sm:$0xff] %v1327_v60  ;;  %1336 = vst [vmem:[%s229_s23 + $0x18] sm:$0xff] %v1328_v61 }
 0x24b   : > { %1337 = vst [vmem:[%s229_s23 + $0x20] sm:$0xff] %v1329_v62  ;;  %1338 = vst [vmem:[%s229_s23 + $0x28] sm:$0xff] %v1330_v63 }
 0x24c   : > { %1339 = vst [vmem:[%s229_s23 + $0x30] sm:$0xff] %v1331_v0  ;;  %1340 = vst [vmem:[%s229_s23 + $0x38] sm:$0xff] %v1332_v1 }
 0x24d   : > { %1820 = shalt.err (!%p1817_p11)
}
 0x24e   : > { %s1821_s11 = scalar_lea.hbm %s2234_s14, 1024  ;;  %s1825_s26 = scalar_lea.hbm %s2282_s4, 2048 }
 0x24f   : > { %p1822_p13 = scmp.ne.s32.totalorder %s2234_s14, %s1821_s11  ;;  %p1826_p12 = scmp.lt.u32.totalorder %s2234_s14, %s2282_s4 }
 0x250   : > { %p1827_p3 = scmp.lt.u32.totalorder %s1825_s26, %s1821_s11  ;;  %p1829_p8 = scmp.lt.u32.totalorder %s1821_s11, %s2234_s14 }
 0x251   : > { %p1823_p2 = pnand %p1822_p13, %p2302_p9 }
 0x252   : > { %p1828_p7 = por %p1827_p3, %p1826_p12 }
 0x253   : > { %p1824_p6 = pneg %p1823_p2 }
 0x254   : > { %p1830_p10 = por %p1829_p8, %p1828_p7 }
 0x256   : > { %p1831_p1 = pnand %p1830_p10, %p1824_p6 }
 0x258   : > { %1834 = shalt.err (!%p1831_p1)
}
 0x259   : > { %s1890_s23 = smov 128   ;;  %s1891_s6 = smov 256  }
 0x25a   : > { %s1892_s19 = smov 8  }
 0x25b   : > { %1681 = dma.vmem_to_hbm [thread:$0]  (%p2302_p9), %s2229_s9, 1024, %s2234_s14, %s1342_s7, %s1890_s23, %s1891_s6, %s1892_s19  }
 0x25c PF: > { %s1369_s25 = sand.u32 1, %s1865_s15   ;;  %p2303_p4 = scmp.ne.s32.totalorder %s2290_s28, 0 }
 0x25d   : > { %p2304_p0 = scmp.ge.s32.totalorder %s1877_s18, 2  ;;  %s1370_s10 = scalar_lea.sflag [#allocation5], %s1369_s25 }
 0x25f   : > { %p1692_p5 = pnand %p2304_p0, %p2303_p4 }
 0x261   : > { %1860 = dma.done.wait (!%p1692_p5), %s1370_s10, 1024  }
 0x262   : > { %1862 = vsyncadd (!%p1692_p5), %s1370_s10, 4294966272  ;;  %p18_p11 = scmp.ge.s32.totalorder %s1943_s21, 4   ;;  %s2305_s15 = smov %s1869_s16 }
 0x263   : > { %s2306_s16 = smov %s1873_s17  ;;  %s2307_s17 = smov %s1955_s24 }
 0x264   : > { %s2308_s18 = smov %s1943_s21  ;;  %20 = sbr.rel (!%p18_p11) target bundleno = 6 (0x6), region = 88 }
 0x26b   :  { %1375 = vsyncpa [#allocation4], 1 }
 0x26c   :  { %1377 = vsyncpa [#allocation4 + $0x1], 1 }
 0x26d   :  { %1378 = vsyncpa [#allocation7], 1 }
 0x26e   :  { %1379 = vsyncpa [#allocation5], 1 }
 0x26f   :  { %1381 = vsyncpa [#allocation5 + $0x1], 1 }

</bundles_post_ra>
